<compile_context>
chip_gen: v7x
topology: tpu7x:2x2x1
jax: 0.10.0
libtpu: 0.0.40
codegen_flags: <defaults>
</compile_context>

<pallas_src>
import functools

import jax
import jax.numpy as jnp
from jax import lax
from jax.experimental import pallas as pl
from jax.experimental.pallas import tpu as pltpu


GCN_EPS = 1e-3   # context-norm epsilon (original TF code)
BN_EPS = 1e-5    # PyTorch BatchNorm default eps
NUM_RES_BLOCKS = 2          # self.numlayer
CONVS_PER_BLOCK = 2         # conv1d_resnet_block has two conv1d_layers


def _input_net_kernel(x_ref, w_in_ref, w_res_ref, vec_ref, o_ref):
    """Processes `bt` batch elements: x_ref (bt, N, Cin) -> o_ref (bt, N, C)."""
    bt, n_pts, c_in = x_ref.shape
    n_convs, _, c_pad = w_res_ref.shape
    c_out = o_ref.shape[-1]
    m = bt * n_pts

    # Hoisted loads (each read exactly once per grid step).
    # N % 8 == 0 is asserted in the wrapper so the (bt,N,*) <-> (bt*N,*)
    # reshapes stay tile-aligned (no VMEM relayout copies).
    x2 = x_ref[...].astype(jnp.float32).reshape(m, c_in)   # (M, Cin)
    w_in = w_in_ref[...]                                   # (Cin, C_pad)  f32
    w_res = w_res_ref[...]                                 # (n_convs, C_pad, C_pad) bf16
    vec = vec_ref[...]                                     # (1+3*n_convs, C_pad) f32

    b_in = vec[0:1, :]
    b_res = vec[1:1 + n_convs, :]
    bn_scale = vec[1 + n_convs:1 + 2 * n_convs, :]
    bn_bias = vec[1 + 2 * n_convs:1 + 3 * n_convs, :]

    # --- conv_in: K = c_in is tiny (e.g. 4) -> unrolled VPU FMAs, no MXU -----
    h = x2[:, 0:1] * w_in[0:1, :] + b_in                   # (M, C_pad)
    for c in range(1, c_in):
        h = h + x2[:, c:c + 1] * w_in[c:c + 1, :]

    def conv1d_layer_post(h, idx):
        # linear (1x1 conv): bf16 operands on the MXU, f32 accumulation.
        # K is kept zero-padded to c_pad (padded lanes of h are exactly zero,
        # so the result is identical; at the paper's C=128 this is a no-op and
        # it avoids a lane-prefix slice of h that could force a relayout).
        lin = jnp.dot(h.astype(jnp.bfloat16), w_res[idx],
                      preferred_element_type=jnp.float32)
        lin = lin + b_res[idx:idx + 1, :]                  # (M, C_pad)
        lin3 = lin.reshape(bt, n_pts, c_pad)
        # context norm (gcn) over the N points, one-pass statistics.
        mu = jnp.mean(lin3, axis=1, keepdims=True)         # (bt, 1, C_pad)
        ex2 = jnp.mean(lin3 * lin3, axis=1, keepdims=True)
        var = ex2 - mu * mu
        # fold gcn rsqrt with the (pre-folded) batchnorm affine:
        #   out = (lin - mu) * rsqrt(var+eps) * bn_scale + bn_bias
        #       =  lin * s + t,  s = rsqrt(var+eps)*bn_scale,  t = bn_bias - mu*s
        s = lax.rsqrt(var + GCN_EPS) * bn_scale[idx:idx + 1, :]
        t = bn_bias[idx:idx + 1, :] - mu * s
        # relu
        return jnp.maximum(lin3 * s + t, 0.0).reshape(m, c_pad)

    # --- two resnet blocks (in==out channels => identity shortcut) -----------
    for blk in range(NUM_RES_BLOCKS):
        skip = h
        h = conv1d_layer_post(h, CONVS_PER_BLOCK * blk + 0)
        h = conv1d_layer_post(h, CONVS_PER_BLOCK * blk + 1)
        h = h + skip

    # Compact store: only the C real channels go back to HBM (lane-dense when
    # C % 128 == 0; masked but 4x less HBM writeback when C < 128).
    h3 = h.reshape(bt, n_pts, c_pad)
    o_ref[...] = h3[:, :, :c_out].astype(o_ref.dtype)


def _pad_lanes(a, c_pad):
    pad = c_pad - a.shape[-1]
    if pad == 0:
        return a
    widths = [(0, 0)] * (a.ndim - 1) + [(0, pad)]
    return jnp.pad(a, widths)


@functools.partial(jax.jit, static_argnames=("out_dtype",))
def input_net_forward(x_nhwc, params, out_dtype=jnp.float32):
    """x_nhwc: [B, 1, N, Cin] (NHWC, H=1).  Returns [B, 1, N, C].

    out_dtype=jnp.bfloat16 halves HBM writeback (recommended on v5e when the
    consumer accepts bf16); internal math stays f32 either way.
    """
    x = jnp.squeeze(x_nhwc, axis=1).astype(jnp.float32)    # (B, N, Cin)
    B, N, Cin = x.shape
    C = params["w_in"].shape[1]
    n_convs = params["w_res"].shape[0]
    assert N % 8 == 0, "N (number of correspondences) must be a multiple of 8"

    # Lane-dense internal channel width: round C up to a multiple of 128 lanes.
    c_pad = 128 * pl.cdiv(C, 128)

    # ---- generation-aware batch-tile selection ------------------------------
    try:
        vmem_cap = int(pltpu.get_tpu_info().vmem_capacity_bytes)
    except Exception:  # conservative default (v7x has 64 MiB per TensorCore)
        vmem_cap = 64 << 20
    budget = min(48 << 20, (vmem_cap * 3) // 8)
    # Per-row (one point) VMEM estimate in f32:
    #   2x double-buffered x block (Cin lane-padded to 128)
    # + 2x double-buffered output block (C lane-padded to >=128)
    # + ~6 live (M, c_pad) activation temporaries (h, skip, lin, epilogue).
    bytes_per_row = 4 * (2 * 128 + 2 * max(c_pad, 128) + 6 * c_pad)
    bt_budget = max(1, budget // (N * bytes_per_row))
    bt_target = max(1, 16384 // N)       # keep the MXU fed: M = bt*N ~ 16K rows
    bt = max(1, min(bt_budget, bt_target, B))
    if B >= 2:                           # >=2 grid steps -> both v7x TCs busy
        bt = min(bt, -(-B // 2))
    B_pad = bt * (-(-B // bt))           # pad B so bt always divides it
    if B_pad != B:
        x = jnp.pad(x, ((0, B_pad - B), (0, 0), (0, 0)))
    grid = (B_pad // bt,)

    # Fold inference BatchNorm into one affine, pack every per-channel vector
    # into a single (1 + 3*n_convs, c_pad) array -> one small DMA stream.
    bn_scale = params["gamma"] * lax.rsqrt(params["var"] + BN_EPS)
    bn_bias = params["beta"] - params["mean"] * bn_scale
    vec = jnp.concatenate(
        [params["b_in"], params["b_res"], bn_scale, bn_bias], axis=0)
    vec = _pad_lanes(vec.astype(jnp.float32), c_pad)

    w_in = _pad_lanes(params["w_in"].astype(jnp.float32), c_pad)   # VPU path: f32
    w_res = _pad_lanes(params["w_res"].astype(jnp.bfloat16), c_pad)    # out cols
    w_res = jnp.pad(w_res, ((0, 0), (0, c_pad - C), (0, 0)))           # in rows (zeros)

    # Explicit scoped-VMEM limit sized from the per-step live set (+ weights).
    est = bt * N * bytes_per_row + w_res.size * 2 + (w_in.size + vec.size) * 4
    vmem_limit = int(min(60 << 20, max(32 << 20, est + (8 << 20))))

    def full(shp):
        rank = len(shp)
        return pl.BlockSpec(shp, lambda g: (0,) * rank)

    out = pl.pallas_call(
        _input_net_kernel,
        out_shape=jax.ShapeDtypeStruct((B_pad, N, C), out_dtype),
        grid=grid,
        in_specs=[
            pl.BlockSpec((bt, N, Cin), lambda g: (g, 0, 0)),   # x
            full((Cin, c_pad)),                                # w_in (f32)
            full((n_convs, c_pad, c_pad)),                     # w_res (bf16)
            full((1 + 3 * n_convs, c_pad)),                    # packed vectors
        ],
        out_specs=pl.BlockSpec((bt, N, C), lambda g: (g, 0, 0)),
        compiler_params=pltpu.CompilerParams(
            dimension_semantics=("parallel",),
            vmem_limit_bytes=vmem_limit),
    )(x, w_in, w_res, vec)

    return out[:B, None, :, :]                               # back to [B, 1, N, C]


def init_params(key, in_channel, nchannel):
    """Deterministic parameter init matching the module's shapes."""
    n_convs = NUM_RES_BLOCKS * CONVS_PER_BLOCK
    k0, k1, k2, k3 = jax.random.split(key, 4)
    scale_in = 1.0 / jnp.sqrt(jnp.float32(in_channel))
    scale_res = 1.0 / jnp.sqrt(jnp.float32(nchannel))
    return {
        "w_in": jax.random.normal(k0, (in_channel, nchannel), jnp.float32) * scale_in,
        "b_in": jax.random.normal(k1, (1, nchannel), jnp.float32) * 0.01,
        "w_res": jax.random.normal(k2, (n_convs, nchannel, nchannel), jnp.float32) * scale_res,
        "b_res": jax.random.normal(k3, (n_convs, nchannel), jnp.float32) * 0.01,
        # BatchNorm params / running stats at PyTorch defaults (deterministic).
        "gamma": jnp.ones((n_convs, nchannel), jnp.float32),
        "beta": jnp.zeros((n_convs, nchannel), jnp.float32),
        "mean": jnp.zeros((n_convs, nchannel), jnp.float32),
        "var": jnp.ones((n_convs, nchannel), jnp.float32),
    }


def _reference(x_nhwc, params):
    """Plain-JAX reference with the same mixed-precision recipe
    (bf16 MXU operands for the res-block matmuls, f32 everywhere else,
    unfolded BatchNorm, two-pass variance)."""
    x = jnp.squeeze(x_nhwc, axis=1).astype(jnp.float32)
    h = jnp.einsum("bnc,cd->bnd", x, params["w_in"]) + params["b_in"]

    def layer(h, idx):
        lin = jnp.einsum("bnc,cd->bnd",
                         h.astype(jnp.bfloat16),
                         params["w_res"][idx].astype(jnp.bfloat16),
                         preferred_element_type=jnp.float32)
        lin = lin + params["b_res"][idx]
        mu = jnp.mean(lin, axis=1, keepdims=True)
        var = jnp.mean((lin - mu) ** 2, axis=1, keepdims=True)
        cn = (lin - mu) / jnp.sqrt(var + GCN_EPS)
        bn = (cn - params["mean"][idx]) / jnp.sqrt(params["var"][idx] + BN_EPS)
        bn = bn * params["gamma"][idx] + params["beta"][idx]
        return jnp.maximum(bn, 0.0)

    for blk in range(NUM_RES_BLOCKS):
        skip = h
        h = layer(h, 2 * blk)
        h = layer(h, 2 * blk + 1)
        h = h + skip
    return h[:, None, :, :]


if __name__ == "__main__":
    # Small config: in_channel=4 (two 2D keypoints), net_nchannel=32, N=16 points.
    B, N, C_IN, C = 2, 16, 4, 32

    key = jax.random.PRNGKey(0)
    k_x, k_p = jax.random.split(key)
    x = jax.random.normal(k_x, (B, 1, N, C_IN), jnp.float32)   # NHWC, H=1
    params = init_params(k_p, C_IN, C)

    out = input_net_forward(x, params)
    out = jax.block_until_ready(out)

    ref = _reference(x, params)
    assert out.shape == (B, 1, N, C), out.shape
    # Tolerance covers bf16-operand matmuls (f32 accumulation), the one-pass
    # variance, and Mosaic-vs-XLA reduction-order differences.
    max_err = float(jnp.max(jnp.abs(out.astype(jnp.float32) - ref)))
    assert jnp.allclose(out.astype(jnp.float32), ref, atol=1e-2, rtol=1e-2), max_err

    print("KERNEL_OK")
</pallas_src>

<mosaic_0001>
module attributes {stable_mosaic.version = 11 : i64} {
  func.func @_input_net_kernel(%arg0: i32, %arg1: memref<1x16x4xf32, #tpu.memory_space<vmem>>, %arg2: memref<4x128xf32, #tpu.memory_space<vmem>>, %arg3: memref<4x128x128xbf16, #tpu.memory_space<vmem>>, %arg4: memref<13x128xf32, #tpu.memory_space<vmem>>, %arg5: memref<1x16x32xf32, #tpu.memory_space<vmem>>) attributes {dimension_semantics = [#tpu.dimension_semantics<parallel>], iteration_bounds = array<i64: 2>, scalar_prefetch = 0 : i64, scratch_operands = 0 : i64, tpu.core_type = #tpu.core_type<tc>, window_params = [{transform_indices = @transform_0, window_bounds = array<i64: 1, 16, 4>}, {pipeline_mode = #tpu.pipeline_mode<synchronous>, transform_indices = @transform_1, window_bounds = array<i64: 4, 128>}, {pipeline_mode = #tpu.pipeline_mode<synchronous>, transform_indices = @transform_2, window_bounds = array<i64: 4, 128, 128>}, {pipeline_mode = #tpu.pipeline_mode<synchronous>, transform_indices = @transform_3, window_bounds = array<i64: 13, 128>}, {transform_indices = @transform_4, window_bounds = array<i64: 1, 16, 32>}]} {
    %c0 = arith.constant 0 : index
    %c0_0 = arith.constant 0 : index
    %c0_1 = arith.constant 0 : index
    %0 = vector.load %arg1[%c0, %c0_0, %c0_1] : memref<1x16x4xf32, #tpu.memory_space<vmem>>, vector<1x16x4xf32>
    %1 = vector.shape_cast %0 : vector<1x16x4xf32> to vector<16x4xf32>
    %c0_2 = arith.constant 0 : index
    %c0_3 = arith.constant 0 : index
    %2 = vector.load %arg2[%c0_2, %c0_3] : memref<4x128xf32, #tpu.memory_space<vmem>>, vector<4x128xf32>
    %c0_4 = arith.constant 0 : index
    %c0_5 = arith.constant 0 : index
    %c0_6 = arith.constant 0 : index
    %3 = vector.load %arg3[%c0_4, %c0_5, %c0_6] : memref<4x128x128xbf16, #tpu.memory_space<vmem>>, vector<4x128x128xbf16>
    %c0_7 = arith.constant 0 : index
    %c0_8 = arith.constant 0 : index
    %4 = vector.load %arg4[%c0_7, %c0_8] : memref<13x128xf32, #tpu.memory_space<vmem>>, vector<13x128xf32>
    %5 = vector.extract_strided_slice %4 {offsets = [0, 0], sizes = [1, 128], strides = [1, 1]} : vector<13x128xf32> to vector<1x128xf32>
    %6 = vector.extract_strided_slice %4 {offsets = [1, 0], sizes = [4, 128], strides = [1, 1]} : vector<13x128xf32> to vector<4x128xf32>
    %7 = vector.extract_strided_slice %4 {offsets = [5, 0], sizes = [4, 128], strides = [1, 1]} : vector<13x128xf32> to vector<4x128xf32>
    %8 = vector.extract_strided_slice %4 {offsets = [9, 0], sizes = [4, 128], strides = [1, 1]} : vector<13x128xf32> to vector<4x128xf32>
    %9 = vector.extract_strided_slice %1 {offsets = [0, 0], sizes = [16, 1], strides = [1, 1]} : vector<16x4xf32> to vector<16x1xf32>
    %10 = vector.extract_strided_slice %2 {offsets = [0, 0], sizes = [1, 128], strides = [1, 1]} : vector<4x128xf32> to vector<1x128xf32>
    %11 = vector.broadcast %9 : vector<16x1xf32> to vector<16x128xf32>
    %12 = vector.broadcast %10 : vector<1x128xf32> to vector<16x128xf32>
    %13 = arith.mulf %11, %12 : vector<16x128xf32>
    %14 = vector.broadcast %5 : vector<1x128xf32> to vector<16x128xf32>
    %15 = arith.addf %13, %14 : vector<16x128xf32>
    %16 = vector.extract_strided_slice %1 {offsets = [0, 1], sizes = [16, 1], strides = [1, 1]} : vector<16x4xf32> to vector<16x1xf32>
    %17 = vector.extract_strided_slice %2 {offsets = [1, 0], sizes = [1, 128], strides = [1, 1]} : vector<4x128xf32> to vector<1x128xf32>
    %18 = vector.broadcast %16 : vector<16x1xf32> to vector<16x128xf32>
    %19 = vector.broadcast %17 : vector<1x128xf32> to vector<16x128xf32>
    %20 = arith.mulf %18, %19 : vector<16x128xf32>
    %21 = arith.addf %15, %20 : vector<16x128xf32>
    %22 = vector.extract_strided_slice %1 {offsets = [0, 2], sizes = [16, 1], strides = [1, 1]} : vector<16x4xf32> to vector<16x1xf32>
    %23 = vector.extract_strided_slice %2 {offsets = [2, 0], sizes = [1, 128], strides = [1, 1]} : vector<4x128xf32> to vector<1x128xf32>
    %24 = vector.broadcast %22 : vector<16x1xf32> to vector<16x128xf32>
    %25 = vector.broadcast %23 : vector<1x128xf32> to vector<16x128xf32>
    %26 = arith.mulf %24, %25 : vector<16x128xf32>
    %27 = arith.addf %21, %26 : vector<16x128xf32>
    %28 = vector.extract_strided_slice %1 {offsets = [0, 3], sizes = [16, 1], strides = [1, 1]} : vector<16x4xf32> to vector<16x1xf32>
    %29 = vector.extract_strided_slice %2 {offsets = [3, 0], sizes = [1, 128], strides = [1, 1]} : vector<4x128xf32> to vector<1x128xf32>
    %30 = vector.broadcast %28 : vector<16x1xf32> to vector<16x128xf32>
    %31 = vector.broadcast %29 : vector<1x128xf32> to vector<16x128xf32>
    %32 = arith.mulf %30, %31 : vector<16x128xf32>
    %33 = arith.addf %27, %32 : vector<16x128xf32>
    %34 = arith.truncf %33 : vector<16x128xf32> to vector<16x128xbf16>
    %35 = vector.extract_strided_slice %3 {offsets = [0, 0, 0], sizes = [1, 128, 128], strides = [1, 1, 1]} : vector<4x128x128xbf16> to vector<1x128x128xbf16>
    %36 = vector.shape_cast %35 : vector<1x128x128xbf16> to vector<128x128xbf16>
    %cst = arith.constant dense<0.000000e+00> : vector<16x128xf32>
    %37 = tpu.matmul %34, %36, %cst {dimension_numbers = #tpu.dot_dimension_numbers<[1], [0], [0], [1], [0, 0, 1, 1], [], []>} : vector<16x128xbf16>, vector<128x128xbf16>, vector<16x128xf32> -> vector<16x128xf32>
    %38 = vector.extract_strided_slice %6 {offsets = [0, 0], sizes = [1, 128], strides = [1, 1]} : vector<4x128xf32> to vector<1x128xf32>
    %39 = vector.broadcast %38 : vector<1x128xf32> to vector<16x128xf32>
    %40 = arith.addf %37, %39 : vector<16x128xf32>
    %41 = vector.shape_cast %40 : vector<16x128xf32> to vector<1x16x128xf32>
    %cst_9 = arith.constant dense<0.000000e+00> : vector<1x128xf32>
    %42 = vector.multi_reduction <add>, %41, %cst_9 [1] : vector<1x16x128xf32> to vector<1x128xf32>
    %43 = vector.shape_cast %42 : vector<1x128xf32> to vector<1x1x128xf32>
    %cst_10 = arith.constant 1.600000e+01 : f32
    %44 = vector.broadcast %cst_10 : f32 to vector<1x1x128xf32>
    %45 = arith.divf %43, %44 : vector<1x1x128xf32>
    %46 = arith.mulf %41, %41 : vector<1x16x128xf32>
    %cst_11 = arith.constant dense<0.000000e+00> : vector<1x128xf32>
    %47 = vector.multi_reduction <add>, %46, %cst_11 [1] : vector<1x16x128xf32> to vector<1x128xf32>
    %48 = vector.shape_cast %47 : vector<1x128xf32> to vector<1x1x128xf32>
    %cst_12 = arith.constant 1.600000e+01 : f32
    %49 = vector.broadcast %cst_12 : f32 to vector<1x1x128xf32>
    %50 = arith.divf %48, %49 : vector<1x1x128xf32>
    %51 = arith.mulf %45, %45 : vector<1x1x128xf32>
    %52 = arith.subf %50, %51 : vector<1x1x128xf32>
    %cst_13 = arith.constant 1.000000e-03 : f32
    %53 = vector.broadcast %cst_13 : f32 to vector<1x1x128xf32>
    %54 = arith.addf %52, %53 : vector<1x1x128xf32>
    %55 = math.rsqrt %54 : vector<1x1x128xf32>
    %56 = vector.extract_strided_slice %7 {offsets = [0, 0], sizes = [1, 128], strides = [1, 1]} : vector<4x128xf32> to vector<1x128xf32>
    %57 = vector.shape_cast %56 : vector<1x128xf32> to vector<1x1x128xf32>
    %58 = arith.mulf %55, %57 : vector<1x1x128xf32>
    %59 = vector.extract_strided_slice %8 {offsets = [0, 0], sizes = [1, 128], strides = [1, 1]} : vector<4x128xf32> to vector<1x128xf32>
    %60 = arith.mulf %45, %58 : vector<1x1x128xf32>
    %61 = vector.shape_cast %59 : vector<1x128xf32> to vector<1x1x128xf32>
    %62 = arith.subf %61, %60 : vector<1x1x128xf32>
    %63 = vector.broadcast %58 : vector<1x1x128xf32> to vector<1x16x128xf32>
    %64 = arith.mulf %41, %63 : vector<1x16x128xf32>
    %65 = vector.broadcast %62 : vector<1x1x128xf32> to vector<1x16x128xf32>
    %66 = arith.addf %64, %65 : vector<1x16x128xf32>
    %cst_14 = arith.constant 0.000000e+00 : f32
    %67 = vector.broadcast %cst_14 : f32 to vector<1x16x128xf32>
    %68 = arith.maximumf %66, %67 : vector<1x16x128xf32>
    %69 = vector.shape_cast %68 : vector<1x16x128xf32> to vector<16x128xf32>
    %70 = arith.truncf %69 : vector<16x128xf32> to vector<16x128xbf16>
    %71 = vector.extract_strided_slice %3 {offsets = [1, 0, 0], sizes = [1, 128, 128], strides = [1, 1, 1]} : vector<4x128x128xbf16> to vector<1x128x128xbf16>
    %72 = vector.shape_cast %71 : vector<1x128x128xbf16> to vector<128x128xbf16>
    %cst_15 = arith.constant dense<0.000000e+00> : vector<16x128xf32>
    %73 = tpu.matmul %70, %72, %cst_15 {dimension_numbers = #tpu.dot_dimension_numbers<[1], [0], [0], [1], [0, 0, 1, 1], [], []>} : vector<16x128xbf16>, vector<128x128xbf16>, vector<16x128xf32> -> vector<16x128xf32>
    %74 = vector.extract_strided_slice %6 {offsets = [1, 0], sizes = [1, 128], strides = [1, 1]} : vector<4x128xf32> to vector<1x128xf32>
    %75 = vector.broadcast %74 : vector<1x128xf32> to vector<16x128xf32>
    %76 = arith.addf %73, %75 : vector<16x128xf32>
    %77 = vector.shape_cast %76 : vector<16x128xf32> to vector<1x16x128xf32>
    %cst_16 = arith.constant dense<0.000000e+00> : vector<1x128xf32>
    %78 = vector.multi_reduction <add>, %77, %cst_16 [1] : vector<1x16x128xf32> to vector<1x128xf32>
    %79 = vector.shape_cast %78 : vector<1x128xf32> to vector<1x1x128xf32>
    %cst_17 = arith.constant 1.600000e+01 : f32
    %80 = vector.broadcast %cst_17 : f32 to vector<1x1x128xf32>
    %81 = arith.divf %79, %80 : vector<1x1x128xf32>
    %82 = arith.mulf %77, %77 : vector<1x16x128xf32>
    %cst_18 = arith.constant dense<0.000000e+00> : vector<1x128xf32>
    %83 = vector.multi_reduction <add>, %82, %cst_18 [1] : vector<1x16x128xf32> to vector<1x128xf32>
    %84 = vector.shape_cast %83 : vector<1x128xf32> to vector<1x1x128xf32>
    %cst_19 = arith.constant 1.600000e+01 : f32
    %85 = vector.broadcast %cst_19 : f32 to vector<1x1x128xf32>
    %86 = arith.divf %84, %85 : vector<1x1x128xf32>
    %87 = arith.mulf %81, %81 : vector<1x1x128xf32>
    %88 = arith.subf %86, %87 : vector<1x1x128xf32>
    %cst_20 = arith.constant 1.000000e-03 : f32
    %89 = vector.broadcast %cst_20 : f32 to vector<1x1x128xf32>
    %90 = arith.addf %88, %89 : vector<1x1x128xf32>
    %91 = math.rsqrt %90 : vector<1x1x128xf32>
    %92 = vector.extract_strided_slice %7 {offsets = [1, 0], sizes = [1, 128], strides = [1, 1]} : vector<4x128xf32> to vector<1x128xf32>
    %93 = vector.shape_cast %92 : vector<1x128xf32> to vector<1x1x128xf32>
    %94 = arith.mulf %91, %93 : vector<1x1x128xf32>
    %95 = vector.extract_strided_slice %8 {offsets = [1, 0], sizes = [1, 128], strides = [1, 1]} : vector<4x128xf32> to vector<1x128xf32>
    %96 = arith.mulf %81, %94 : vector<1x1x128xf32>
    %97 = vector.shape_cast %95 : vector<1x128xf32> to vector<1x1x128xf32>
    %98 = arith.subf %97, %96 : vector<1x1x128xf32>
    %99 = vector.broadcast %94 : vector<1x1x128xf32> to vector<1x16x128xf32>
    %100 = arith.mulf %77, %99 : vector<1x16x128xf32>
    %101 = vector.broadcast %98 : vector<1x1x128xf32> to vector<1x16x128xf32>
    %102 = arith.addf %100, %101 : vector<1x16x128xf32>
    %cst_21 = arith.constant 0.000000e+00 : f32
    %103 = vector.broadcast %cst_21 : f32 to vector<1x16x128xf32>
    %104 = arith.maximumf %102, %103 : vector<1x16x128xf32>
    %105 = vector.shape_cast %104 : vector<1x16x128xf32> to vector<16x128xf32>
    %106 = arith.addf %105, %33 : vector<16x128xf32>
    %107 = arith.truncf %106 : vector<16x128xf32> to vector<16x128xbf16>
    %108 = vector.extract_strided_slice %3 {offsets = [2, 0, 0], sizes = [1, 128, 128], strides = [1, 1, 1]} : vector<4x128x128xbf16> to vector<1x128x128xbf16>
    %109 = vector.shape_cast %108 : vector<1x128x128xbf16> to vector<128x128xbf16>
    %cst_22 = arith.constant dense<0.000000e+00> : vector<16x128xf32>
    %110 = tpu.matmul %107, %109, %cst_22 {dimension_numbers = #tpu.dot_dimension_numbers<[1], [0], [0], [1], [0, 0, 1, 1], [], []>} : vector<16x128xbf16>, vector<128x128xbf16>, vector<16x128xf32> -> vector<16x128xf32>
    %111 = vector.extract_strided_slice %6 {offsets = [2, 0], sizes = [1, 128], strides = [1, 1]} : vector<4x128xf32> to vector<1x128xf32>
    %112 = vector.broadcast %111 : vector<1x128xf32> to vector<16x128xf32>
    %113 = arith.addf %110, %112 : vector<16x128xf32>
    %114 = vector.shape_cast %113 : vector<16x128xf32> to vector<1x16x128xf32>
    %cst_23 = arith.constant dense<0.000000e+00> : vector<1x128xf32>
    %115 = vector.multi_reduction <add>, %114, %cst_23 [1] : vector<1x16x128xf32> to vector<1x128xf32>
    %116 = vector.shape_cast %115 : vector<1x128xf32> to vector<1x1x128xf32>
    %cst_24 = arith.constant 1.600000e+01 : f32
    %117 = vector.broadcast %cst_24 : f32 to vector<1x1x128xf32>
    %118 = arith.divf %116, %117 : vector<1x1x128xf32>
    %119 = arith.mulf %114, %114 : vector<1x16x128xf32>
    %cst_25 = arith.constant dense<0.000000e+00> : vector<1x128xf32>
    %120 = vector.multi_reduction <add>, %119, %cst_25 [1] : vector<1x16x128xf32> to vector<1x128xf32>
    %121 = vector.shape_cast %120 : vector<1x128xf32> to vector<1x1x128xf32>
    %cst_26 = arith.constant 1.600000e+01 : f32
    %122 = vector.broadcast %cst_26 : f32 to vector<1x1x128xf32>
    %123 = arith.divf %121, %122 : vector<1x1x128xf32>
    %124 = arith.mulf %118, %118 : vector<1x1x128xf32>
    %125 = arith.subf %123, %124 : vector<1x1x128xf32>
    %cst_27 = arith.constant 1.000000e-03 : f32
    %126 = vector.broadcast %cst_27 : f32 to vector<1x1x128xf32>
    %127 = arith.addf %125, %126 : vector<1x1x128xf32>
    %128 = math.rsqrt %127 : vector<1x1x128xf32>
    %129 = vector.extract_strided_slice %7 {offsets = [2, 0], sizes = [1, 128], strides = [1, 1]} : vector<4x128xf32> to vector<1x128xf32>
    %130 = vector.shape_cast %129 : vector<1x128xf32> to vector<1x1x128xf32>
    %131 = arith.mulf %128, %130 : vector<1x1x128xf32>
    %132 = vector.extract_strided_slice %8 {offsets = [2, 0], sizes = [1, 128], strides = [1, 1]} : vector<4x128xf32> to vector<1x128xf32>
    %133 = arith.mulf %118, %131 : vector<1x1x128xf32>
    %134 = vector.shape_cast %132 : vector<1x128xf32> to vector<1x1x128xf32>
    %135 = arith.subf %134, %133 : vector<1x1x128xf32>
    %136 = vector.broadcast %131 : vector<1x1x128xf32> to vector<1x16x128xf32>
    %137 = arith.mulf %114, %136 : vector<1x16x128xf32>
    %138 = vector.broadcast %135 : vector<1x1x128xf32> to vector<1x16x128xf32>
    %139 = arith.addf %137, %138 : vector<1x16x128xf32>
    %cst_28 = arith.constant 0.000000e+00 : f32
    %140 = vector.broadcast %cst_28 : f32 to vector<1x16x128xf32>
    %141 = arith.maximumf %139, %140 : vector<1x16x128xf32>
    %142 = vector.shape_cast %141 : vector<1x16x128xf32> to vector<16x128xf32>
    %143 = arith.truncf %142 : vector<16x128xf32> to vector<16x128xbf16>
    %144 = vector.extract_strided_slice %3 {offsets = [3, 0, 0], sizes = [1, 128, 128], strides = [1, 1, 1]} : vector<4x128x128xbf16> to vector<1x128x128xbf16>
    %145 = vector.shape_cast %144 : vector<1x128x128xbf16> to vector<128x128xbf16>
    %cst_29 = arith.constant dense<0.000000e+00> : vector<16x128xf32>
    %146 = tpu.matmul %143, %145, %cst_29 {dimension_numbers = #tpu.dot_dimension_numbers<[1], [0], [0], [1], [0, 0, 1, 1], [], []>} : vector<16x128xbf16>, vector<128x128xbf16>, vector<16x128xf32> -> vector<16x128xf32>
    %147 = vector.extract_strided_slice %6 {offsets = [3, 0], sizes = [1, 128], strides = [1, 1]} : vector<4x128xf32> to vector<1x128xf32>
    %148 = vector.broadcast %147 : vector<1x128xf32> to vector<16x128xf32>
    %149 = arith.addf %146, %148 : vector<16x128xf32>
    %150 = vector.shape_cast %149 : vector<16x128xf32> to vector<1x16x128xf32>
    %cst_30 = arith.constant dense<0.000000e+00> : vector<1x128xf32>
    %151 = vector.multi_reduction <add>, %150, %cst_30 [1] : vector<1x16x128xf32> to vector<1x128xf32>
    %152 = vector.shape_cast %151 : vector<1x128xf32> to vector<1x1x128xf32>
    %cst_31 = arith.constant 1.600000e+01 : f32
    %153 = vector.broadcast %cst_31 : f32 to vector<1x1x128xf32>
    %154 = arith.divf %152, %153 : vector<1x1x128xf32>
    %155 = arith.mulf %150, %150 : vector<1x16x128xf32>
    %cst_32 = arith.constant dense<0.000000e+00> : vector<1x128xf32>
    %156 = vector.multi_reduction <add>, %155, %cst_32 [1] : vector<1x16x128xf32> to vector<1x128xf32>
    %157 = vector.shape_cast %156 : vector<1x128xf32> to vector<1x1x128xf32>
    %cst_33 = arith.constant 1.600000e+01 : f32
    %158 = vector.broadcast %cst_33 : f32 to vector<1x1x128xf32>
    %159 = arith.divf %157, %158 : vector<1x1x128xf32>
    %160 = arith.mulf %154, %154 : vector<1x1x128xf32>
    %161 = arith.subf %159, %160 : vector<1x1x128xf32>
    %cst_34 = arith.constant 1.000000e-03 : f32
    %162 = vector.broadcast %cst_34 : f32 to vector<1x1x128xf32>
    %163 = arith.addf %161, %162 : vector<1x1x128xf32>
    %164 = math.rsqrt %163 : vector<1x1x128xf32>
    %165 = vector.extract_strided_slice %7 {offsets = [3, 0], sizes = [1, 128], strides = [1, 1]} : vector<4x128xf32> to vector<1x128xf32>
    %166 = vector.shape_cast %165 : vector<1x128xf32> to vector<1x1x128xf32>
    %167 = arith.mulf %164, %166 : vector<1x1x128xf32>
    %168 = vector.extract_strided_slice %8 {offsets = [3, 0], sizes = [1, 128], strides = [1, 1]} : vector<4x128xf32> to vector<1x128xf32>
    %169 = arith.mulf %154, %167 : vector<1x1x128xf32>
    %170 = vector.shape_cast %168 : vector<1x128xf32> to vector<1x1x128xf32>
    %171 = arith.subf %170, %169 : vector<1x1x128xf32>
    %172 = vector.broadcast %167 : vector<1x1x128xf32> to vector<1x16x128xf32>
    %173 = arith.mulf %150, %172 : vector<1x16x128xf32>
    %174 = vector.broadcast %171 : vector<1x1x128xf32> to vector<1x16x128xf32>
    %175 = arith.addf %173, %174 : vector<1x16x128xf32>
    %cst_35 = arith.constant 0.000000e+00 : f32
    %176 = vector.broadcast %cst_35 : f32 to vector<1x16x128xf32>
    %177 = arith.maximumf %175, %176 : vector<1x16x128xf32>
    %178 = vector.shape_cast %177 : vector<1x16x128xf32> to vector<16x128xf32>
    %179 = arith.addf %178, %106 : vector<16x128xf32>
    %180 = vector.shape_cast %179 : vector<16x128xf32> to vector<1x16x128xf32>
    %181 = vector.extract_strided_slice %180 {offsets = [0, 0, 0], sizes = [1, 16, 32], strides = [1, 1, 1]} : vector<1x16x128xf32> to vector<1x16x32xf32>
    %c0_36 = arith.constant 0 : index
    %c0_37 = arith.constant 0 : index
    %c0_38 = arith.constant 0 : index
    %182 = vector.load %arg5[%c0_36, %c0_37, %c0_38] : memref<1x16x32xf32, #tpu.memory_space<vmem>>, vector<1x16x32xf32>
    tpu.vector_store %arg5[%c0_36, %c0_37, %c0_38], %181 {strides = array<i32>} : memref<1x16x32xf32, #tpu.memory_space<vmem>>, vector<1x16x32xf32>,
    return
  }
  func.func @transform_0(%arg0: i32) -> (i32, i32, i32) {
    %c0_i32 = arith.constant 0 : i32
    %c0_i32_0 = arith.constant 0 : i32
    %c0_i32_1 = arith.constant 0 : i32
    return %arg0, %c0_i32, %c0_i32_0 : i32, i32, i32
  }
  func.func @transform_1(%arg0: i32) -> (i32, i32) {
    %c0_i32 = arith.constant 0 : i32
    %c0_i32_0 = arith.constant 0 : i32
    %c0_i32_1 = arith.constant 0 : i32
    return %c0_i32, %c0_i32_0 : i32, i32
  }
  func.func @transform_2(%arg0: i32) -> (i32, i32, i32) {
    %c0_i32 = arith.constant 0 : i32
    %c0_i32_0 = arith.constant 0 : i32
    %c0_i32_1 = arith.constant 0 : i32
    %c0_i32_2 = arith.constant 0 : i32
    return %c0_i32, %c0_i32_0, %c0_i32_1 : i32, i32, i32
  }
  func.func @transform_3(%arg0: i32) -> (i32, i32) {
    %c0_i32 = arith.constant 0 : i32
    %c0_i32_0 = arith.constant 0 : i32
    %c0_i32_1 = arith.constant 0 : i32
    return %c0_i32, %c0_i32_0 : i32, i32
  }
  func.func @transform_4(%arg0: i32) -> (i32, i32, i32) {
    %c0_i32 = arith.constant 0 : i32
    %c0_i32_0 = arith.constant 0 : i32
    %c0_i32_1 = arith.constant 0 : i32
    return %arg0, %c0_i32, %c0_i32_0 : i32, i32, i32
  }
}

</mosaic_0001>

<bundles_post_ra>
// kernel: input_net_forward.1
= control target key start
LH: loop header
LB: loop body
LE: loop exit
PB: predicated region body
PF: predicated region fallthrough
CT: control target
= control target key end

     0   :  { %9 = vsyncpa [#allocation3], 0  ;;  %s1628_s0 = inlined_call_operand.vmem [shape: f32[2,16,4], index: 0, kind: input, shape index: {}]   ;;  %s1629_s1 = inlined_call_operand.vmem [shape: f32[4,128], index: 1, kind: input, shape index: {}]   ;;  %s1630_s2 = inlined_call_operand.vmem [shape: bf16[4,128,128], index: 2, kind: input, shape index: {}]   ;;  %s1631_s3 = inlined_call_operand.vmem [shape: f32[13,128], index: 3, kind: input, shape index: {}]   ;;  %s1632_s4 = inlined_call_operand.hbm [shape: f32[2,16,32], index: 4, kind: output, shape index: {}]  }
   0x1   :  { %11 = vsyncpa [#allocation3 + $0x1], 0  ;;  %s1317_s15 = smov 0   ;;  %s1319_s16 = smov 0  }
   0x2   :  { %s1321_s17 = smov 0   ;;  %s1323_s18 = smov 0  }
   0x3 LB: > { %s1338_s19 = sadd.s32 4294967295, %s1281_s18   ;;  %s964_s20 = sadd.s32 4294967294, %s1281_s18   ;;  %s1281_s18 = sphi %s1323_s18, %s1638_s18   ;;  %s1277_s17 = sphi %s1321_s17, %s1637_s17   ;;  %s1273_s16 = sphi %s1319_s16, %s1636_s16   ;;  %s1269_s15 = sphi %s1317_s15, %s1635_s15  }
   0x4   : > { %s1342_s21 = sadd.s32 1, %s1281_s18   ;;  %s113_s22 = sadd.s32 1, %s1277_s17 }
   0x5   : > { %s110_s23 = ssub.s32 %s1281_s18, %s1342_s21  ;;  %p123_p0 = scmp.ne.s32.totalorder %s1277_s17, %s1273_s16 }
   0x6   : > { %p111_p1 = scmp.eq.s32.totalorder %s110_s23, 0  ;;  %p124_p2 = scmp.eq.s32.totalorder %s1338_s19, 1 }
   0x7   : > { %p129_p3 = scmp.ne.s32.totalorder %s1273_s16, %s1269_s15  ;;  %p130_p4 = scmp.eq.s32.totalorder %s964_s20, 1 }
   0x8   : > { %s1353_s24 = scalar_select %p111_p1, %s1277_s17, %s113_s22  }
   0x9   : > { %p1355_p5 = por %p124_p2, %p123_p0  ;;  %p1359_p6 = por %p130_p4, %p129_p3 }
   0xa   : > { %p967_p7 = scmp.ge.s32.totalorder %s1281_s18, 1  ;;  %p165_p8 = scmp.lt.s32.totalorder %s1281_s18, 3 }
   0xc   : > { %p166_p9 = pnand %p967_p7, %p165_p8 }
   0xd   : > { %p191_p10 = scmp.lt.s32.totalorder (!%p166_p9), %s1338_s19, 1  ;;  %v1179_v0 = vld [vmem:[%s1630_s2] sm:$0xff] (!%p166_p9)   ;;  %v1283_v1 = vmov (!%p166_p9), 1   ;;  %v1284_v2 = vmov (!%p166_p9), 0   ;;  %v1285_v3 = vmov (!%p166_p9), 0.0   ;;  %v1180_v4 = vld [vmem:[%s1630_s2 + $0x8] sm:$0xff] (!%p166_p9)   ;;  %v276_v15 = vlaneseq (!%p166_p9) }
   0xe   : > { %169 = sbr.rel (%p166_p9) target bundleno = 1251 (0x4e3), region = 36  ;;  %1174 = vset.pattern.permute.xlu1 (!%p166_p9), %v1283_v1  ;;  %1173 = vset.pattern.permute.xlu0 (!%p166_p9), %v1284_v2  ;;  %v1181_v6 = vld [vmem:[%s1630_s2 + $0x10] sm:$0xff] (!%p166_p9)   ;;  %v1182_v8 = vld [vmem:[%s1630_s2 + $0x18] sm:$0xff] (!%p166_p9)   ;;  %v1286_v9 = vmov (!%p166_p9), 2   ;;  %v1183_v10 = vld [vmem:[%s1630_s2 + $0x20] sm:$0xff] (!%p166_p9)   ;;  %v1287_v11 = vmov (!%p166_p9), 3  }
   0xf   : > { %1046 = vmatprep.subr.bf16.mxu0 (!%p166_p9), %v1285_v3  ;;  %1066 = vmatprep.subr.bf16.mxu1 (!%p166_p9), %v1285_v3  ;;  %v1184_v12 = vld [vmem:[%s1630_s2 + $0x28] sm:$0xff] (!%p166_p9)   ;;  %v1185_v13 = vld [vmem:[%s1630_s2 + $0x30] sm:$0xff] (!%p166_p9)   ;;  %vm1288_vm0 = vmmov (!%p166_p9), 0   ;;  %v1186_v14 = vld [vmem:[%s1630_s2 + $0x38] sm:$0xff] (!%p166_p9)   ;;  %v1408_v16 = vshrl.u32 (!%p166_p9), %v276_v15, 7  ;;  %s188_s8 = sand.u32 (!%p166_p9), 1, %s1273_s16  }
  0x10   : > { %1047 = vmatpush3.bf16.msra.mxu0 (!%p166_p9), %v1179_v0  ;;  %1062 = vmatprep.mubr.msk.bf16.mxu0 (!%p166_p9), %vm1288_vm0, %v1285_v3  ;;  %v199_v18 = vld [vmem:[%s1629_s1] sm:$0xf] (!%p166_p9)  ;;  %v1188_v54 = vld [vmem:[%s1630_s2 + $0x48] sm:$0xff] (!%p166_p9)   ;;  %v1189_v55 = vld [vmem:[%s1630_s2 + $0x50] sm:$0xff] (!%p166_p9)   ;;  %s1009_s10 = sshll.u32 (!%p166_p9), %s1338_s19, 8  ;;  %vm885_vm1 = vcmask (!%p166_p9), 261120  }
  0x11   : > { %1048 = vmatprep.subr.bf16.mxu0 (!%p166_p9), %v1285_v3  ;;  %1082 = vmatprep.mubr.msk.bf16.mxu1 (!%p166_p9), %vm1288_vm0, %v1285_v3  ;;  %v1411_v17 = vsub.s32 (!%p166_p9), 0, %v1408_v16  ;;  %v1420_v22 = vld [vmem:[%s1631_s3] sm:$0xff] (!%p166_p9)  ;;  %v1423_v23 = vsub.s32 (!%p166_p9), 1, %v1408_v16  ;;  %v1426_v24 = vsub.s32 (!%p166_p9), 2, %v1408_v16  ;;  %v1431_v30 = vsub.s32 (!%p166_p9), 3, %v1408_v16  ;;  %v1190_v56 = vld [vmem:[%s1630_s2 + $0x58] sm:$0xff] (!%p166_p9)   ;;  %s1581_s20 = scalar_lea.hbm (!%p166_p9), %s1632_s4, %s1009_s10 }
  0x12   : > { %v1187_v53 = vld [vmem:[%s1630_s2 + $0x40] sm:$0xff] (!%p166_p9)   ;;  %v1192_v58 = vld [vmem:[%s1630_s2 + $0x68] sm:$0xff] (!%p166_p9)   ;;  %v1193_v59 = vld [vmem:[%s1630_s2 + $0x70] sm:$0xff] (!%p166_p9)   ;;  %s1289_s23 = smov (!%p166_p9), [#allocation2]  }
  0x13   : > { %v279_v21 = vrot.slane (!%p166_p9), %v199_v18, %v1411_v17  ;;  %v285_v27 = vrot.slane (!%p166_p9), %v1420_v22, %v1411_v17  ;;  %v299_v31 = vrot.slane (!%p166_p9), %v199_v18, %v1423_v23  ;;  %v315_v33 = vrot.slane (!%p166_p9), %v199_v18, %v1426_v24  ;;  %1067 = vmatpush3.bf16.msra.mxu1 (!%p166_p9), %v1187_v53  ;;  %v1191_v57 = vld [vmem:[%s1630_s2 + $0x60] sm:$0xff] (!%p166_p9)   ;;  %v1194_v60 = vld [vmem:[%s1630_s2 + $0x78] sm:$0xff] (!%p166_p9)   ;;  %s1223_s27 = sshll.u32 (!%p166_p9), %s1289_s23, 4  ;;  %s1224_s27 = int_to_ptr.vmem [resolvable:$false] %s1223_s27 }
  0x14   : > { %1049 = vmatpush3.bf16.msra.mxu0 (!%p166_p9), %v1180_v4  ;;  %v331_v38 = vrot.slane (!%p166_p9), %v199_v18, %v1431_v30  ;;  %1068 = vmatprep.subr.bf16.mxu1 (!%p166_p9), %v1285_v3  ;;  %v340_v61 = vrot.slane (!%p166_p9), %v1420_v22, %v1423_v23  ;;  %v1199_v53 = vld [vmem:[%s1630_s2 + $0xa0] sm:$0xff] (!%p166_p9)   ;;  %s1225_s28 = scalar_lea.vmem (!%p166_p9), %s1224_s27, 512 }
  0x15   : > { %s192_s29 = scalar_select %p191_p10, %s1338_s19, 1  ;;  %1050 = vmatprep.subr.bf16.mxu0 %v1285_v3 }
  0x16   : > { %s1587_s19 = scalar_lea.sflag [#allocation3], %s188_s8 }
  0x17   : > { %s1008_s30 = sshll.u32 %s192_s29, 4  ;;  %1069 = vmatpush3.bf16.msra.mxu1 %v1188_v54  ;;  %v1200_v54 = vld [vmem:[%s1630_s2 + $0xa8] sm:$0xff]  }
  0x18   : > { %s195_s9 = scalar_lea.vmem %s1628_s0, %s1008_s30  ;;  %1051 = vmatpush3.bf16.msra.mxu0 %v1181_v6  ;;  %1070 = vmatprep.subr.bf16.mxu1 %v1285_v3 }
  0x19   : > { %v197_v5 = vld [vmem:[%s195_s9] sm:$0xff]  ;;  %v198_v7 = vld [vmem:[%s195_s9 + $0x8] sm:$0xff]  ;;  %1052 = vmatprep.subr.bf16.mxu0 %v1285_v3  ;;  %s968_s9 = sshll.u32 %s188_s8, 4 }
  0x1a   : > { %289 = vperm.xlu1 %1174, %v197_v5   ;;  %268 = vperm.xlu0 %1173, %v197_v5   ;;  %s190_s11 = scalar_lea.vmem [#allocation2], %s968_s9 }
  0x1b   : > { %1071 = vmatpush3.bf16.msra.mxu1 %v1189_v55  ;;  %v1201_v55 = vld [vmem:[%s1630_s2 + $0xb0] sm:$0xff]   ;;  %s902_s12 = sshll.u32 %s190_s11, 4  ;;  %s1583_s12 = int_to_ptr.vmem [resolvable:$true] %s902_s12 }
  0x1c   : > { %1053 = vmatpush3.bf16.msra.mxu0 %v1182_v8  ;;  %1072 = vmatprep.subr.bf16.mxu1 %v1285_v3  ;;  %s1219_s22 = scalar_lea.vmem %s1583_s12, 256  ;;  %p1226_p0 = scmp.lt.s32.totalorder %s1583_s12, %s1224_s27 }
  0x1d   : > { %1054 = vmatprep.subr.bf16.mxu0 %v1285_v3  ;;  %p1220_p11 = scmp.ne.s32.totalorder %s1583_s12, %s1219_s22  ;;  %p1227_p1 = scmp.lt.s32.totalorder %s1225_s28, %s1219_s22 }
  0x1e   : > { %293 = vperm.xlu1 %1174, %v198_v7   ;;  %273 = vperm.xlu0 %1173, %v198_v7  }
  0x1f   : > { %1073 = vmatpush3.bf16.msra.mxu1 %v1190_v56  ;;  %v1202_v56 = vld [vmem:[%s1630_s2 + $0xb8] sm:$0xff]   ;;  %p1221_p12 = pnand %p1220_p11, %p1355_p5  ;;  %p1228_p2 = por %p1227_p1, %p1226_p0 }
  0x20   : > { %1055 = vmatpush3.bf16.msra.mxu0 %v1183_v10  ;;  %1074 = vmatprep.subr.bf16.mxu1 %v1285_v3 }
  0x21   : > { %1056 = vmatprep.subr.bf16.mxu0 %v1285_v3  ;;  %p1222_p13 = pneg %p1221_p12 }
  0x22   : > { %1176 = vset.pattern.permute.xlu1 %v1286_v9  ;;  %1175 = vset.pattern.permute.xlu0 %v1286_v9 }
  0x23   : > { %309 = vperm.xlu1 %1176, %v198_v7   ;;  %305 = vperm.xlu0 %1175, %v197_v5   ;;  %p1229_p3 = pnand %p1228_p2, %p1222_p13 }
  0x24   : > { %1057 = vmatpush3.bf16.msra.mxu0 %v1184_v12  ;;  %1075 = vmatpush3.bf16.msra.mxu1 %v1191_v57  ;;  %v477_v57 = vrot.slane %v1420_v22, %v1426_v24 }
  0x25   : > { %1058 = vmatprep.subr.bf16.mxu0 %v1285_v3  ;;  %1076 = vmatprep.subr.bf16.mxu1 %v1285_v3 }
  0x27   : > { %1177 = vset.pattern.permute.xlu1 %v1287_v11  ;;  %1178 = vset.pattern.permute.xlu0 %v1287_v11 }
  0x28   : > { %321 = vperm.xlu1 %1177, %v197_v5   ;;  %325 = vperm.xlu0 %1178, %v198_v7  }
  0x29   : > { %1059 = vmatpush3.bf16.msra.mxu0 %v1185_v13  ;;  %1077 = vmatpush3.bf16.msra.mxu1 %v1192_v58 }
  0x2a   : > { %1060 = vmatprep.subr.bf16.mxu0 %v1285_v3  ;;  %1078 = vmatprep.subr.bf16.mxu1 %v1285_v3 }
  0x2d   : > { %1061 = vmatpush3.bf16.msra.mxu0 %v1186_v14  ;;  %1079 = vmatpush3.bf16.msra.mxu1 %v1193_v59 }
  0x2e   : > { %1086 = vmatprep.subr.bf16.mxu0 %v1285_v3  ;;  %1080 = vmatprep.subr.bf16.mxu1 %v1285_v3 }
  0x31   : > { %1081 = vmatpush3.bf16.msra.mxu1 %v1194_v60 }
  0x32   : > { %1106 = vmatprep.subr.bf16.mxu1 %v1285_v3 }
  0x99   : > { %v290_v19 = vpop.permute.xlu1 %289  ;;  %v269_v20 = vpop.permute.xlu0 %268 }
  0x9a   : > { %v280_v28 = vmul.f32 %v279_v21, %v269_v20  ;;  %v300_v39 = vmul.f32 %v299_v31, %v290_v19 }
  0x9c   : > { %v286_v34 = vadd.f32 %v285_v27, %v280_v28 }
  0x9d   : > { %v294_v25 = vpop.permute.xlu1 %293  ;;  %v274_v26 = vpop.permute.xlu0 %273 }
  0x9e   : > { %v281_v29 = vmul.f32 %v279_v21, %v274_v26  ;;  %v301_v35 = vmul.f32 %v299_v31, %v294_v25  ;;  %v302_v43 = vadd.f32 %v300_v39, %v286_v34 }
  0xa0   : > { %v287_v32 = vadd.f32 %v285_v27, %v281_v29 }
  0xa2   : > { %v310_v36 = vpop.permute.xlu1 %309  ;;  %v306_v37 = vpop.permute.xlu0 %305  ;;  %v303_v40 = vadd.f32 %v301_v35, %v287_v32  ;;  %v461_v32 = vsub.s32 5, %v1408_v16 }
  0xa3   : > { %v317_v41 = vmul.f32 %v315_v33, %v310_v36  ;;  %v316_v42 = vmul.f32 %v315_v33, %v306_v37  ;;  %v1483_v37 = vld [vmem:[%s1631_s3 + $0x8] sm:$0x1f] }
  0xa5   : > { %v319_v46 = vadd.f32 %v317_v41, %v303_v40  ;;  %v318_v47 = vadd.f32 %v316_v42, %v302_v43 }
  0xa7   : > { %v322_v44 = vpop.permute.xlu1 %321  ;;  %v326_v45 = vpop.permute.xlu0 %325 }
  0xa8   : > { %v332_v48 = vmul.f32 %v331_v38, %v322_v44  ;;  %v333_v49 = vmul.f32 %v331_v38, %v326_v45 }
  0xaa   : > { %v1436_v50 = vadd.f32 %v332_v48, %v318_v47  ;;  %v1438_v51 = vadd.f32 %v333_v49, %v319_v46  ;;  %v1195_v48 = vld [vmem:[%s1630_s2 + $0x80] sm:$0xff]   ;;  %v1197_v49 = vld [vmem:[%s1630_s2 + $0x90] sm:$0xff]  }
  0xac   : > { %v336_v52 = vpack.c.bf16 %v1438_v51, %v1436_v50 }
  0xae   : > { %1063 = vmatmul.mubr.bf16.vlgmr.msra.gmra.mrb[0].mxu0 %v336_v52  ;;  %v1198_v52 = vld [vmem:[%s1630_s2 + $0x98] sm:$0xff]  }
  0xaf   : > { %1102 = vmatprep.mubr.msk.bf16.mxu0 %vm1288_vm0, %v1285_v3  ;;  %1087 = vmatpush3.bf16.msra.mxu0 %v1195_v48  ;;  %v1208_v48 = vld [vmem:[%s1630_s2 + $0xe8] sm:$0xff]  }
  0xb0   : > { %1088 = vmatprep.subr.bf16.mxu0 %v1285_v3 }
 0x181   : > { %v423_v62 = vpop.f32.mrb[0].mxu0 }
 0x182   : > { %v424_v63 = vadd.f32 %v423_v62, %v340_v61  ;;  %v1064_v0 = vpop.f32.mrb[1].mxu0 }
 0x183   : > { %v426_v1 = vpop.f32.mrb[2].mxu0 }
 0x184   : > { %v427_v2 = vadd.f32 %v426_v1, %v340_v61  ;;  %v1065_v4 = vpop.f32.mrb[3].mxu0  ;;  %v439_v5 = vmul.f32 %v424_v63, %v424_v63 }
 0x186   : > { %v430_v6 = vadd.f32 %v427_v2, %v424_v63  ;;  %v440_v7 = vmul.f32 %v427_v2, %v427_v2 }
 0x188   : > { %v431_v8 = vrot.slane %v430_v6, 4  ;;  %v441_v9 = vadd.f32 %v440_v7, %v439_v5 }
 0x18a   : > { %v432_v10 = vadd.f32 %v431_v8, %v430_v6  ;;  %v442_v11 = vrot.slane %v441_v9, 4 }
 0x18c   : > { %v433_v12 = vrot.slane %v432_v10, 2  ;;  %v443_v13 = vadd.f32 %v442_v11, %v441_v9 }
 0x18e   : > { %v434_v14 = vadd.f32 %v433_v12, %v432_v10  ;;  %v444_v15 = vrot.slane %v443_v13, 2 }
 0x190   : > { %v435_v18 = vrot.slane %v434_v14, 1  ;;  %v445_v19 = vadd.f32 %v444_v15, %v443_v13 }
 0x192   : > { %v436_v20 = vadd.f32 %v435_v18, %v434_v14  ;;  %v446_v21 = vrot.slane %v445_v19, 1 }
 0x194   : > { %v438_v25 = vmul.f32 0.0625, %v436_v20  ;;  %v447_v26 = vadd.f32 %v446_v21, %v445_v19 }
 0x196   : > { %v448_v27 = vmul.f32 0.0625, %v447_v26  ;;  %v449_v28 = vmul.f32 %v438_v25, %v438_v25 }
 0x198   : > { %v450_v29 = vsub.f32 %v448_v27, %v449_v28  ;;  %v597_v27 = vsub.s32 6, %v1408_v16 }
 0x19a   : > { %v451_v31 = vadd.f32 0.001, %v450_v29 }
 0x19c   : > { %1211 = vrsqrt.f32 %v451_v31 }
 0x1a6   : > { %v1212_v33 = vpop.eup %1211 }
 0x1a7   : > { %v453_v34 = vmul.f32 %v1212_v33, %v1420_v22 }
 0x1a9   : > { %v454_v35 = vmul.f32 %v453_v34, %v438_v25  ;;  %v462_v36 = vrot.slane %v453_v34, %v461_v32 }
 0x1ab   : > { %v456_v38 = vrot.slane %v454_v35, 4  ;;  %v464_v39 = vmul.f32 %v462_v36, %v427_v2  ;;  %v463_v40 = vmul.f32 %v462_v36, %v424_v63 }
 0x1ad   : > { %v458_v41 = vsub.f32 %v1483_v37, %v456_v38 }
 0x1af   : > { %v468_v42 = vrot.slane %v458_v41, %v1423_v23  ;;  %v1196_v23 = vld [vmem:[%s1630_s2 + $0x88] sm:$0xff]  }
 0x1b0   : > { %1089 = vmatpush3.bf16.msra.mxu0 %v1196_v23  ;;  %v1209_v23 = vld [vmem:[%s1630_s2 + $0xf0] sm:$0xff]  }
 0x1b1   : > { %v469_v43 = vadd.f32 %v468_v42, %v463_v40  ;;  %v470_v44 = vadd.f32 %v468_v42, %v464_v39  ;;  %1090 = vmatprep.subr.bf16.mxu0 %v1285_v3 }
 0x1b3   : > { %v471_v45 = vmax.f32 %v469_v43, 0.0  ;;  %v472_v46 = vmax.f32 %v470_v44, 0.0 }
 0x1b4   : > { %1091 = vmatpush3.bf16.msra.mxu0 %v1197_v49  ;;  %v1210_v49 = vld [vmem:[%s1630_s2 + $0xf8] sm:$0xff]  }
 0x1b5   : > { %v473_v47 = vpack.c.bf16 %v472_v46, %v471_v45  ;;  %1092 = vmatprep.subr.bf16.mxu0 %v1285_v3  ;;  %v1203_v46 = vld [vmem:[%s1630_s2 + $0xc0] sm:$0xff]  }
 0x1b7   : > { %1083 = vmatmul.mubr.bf16.vlgmr.msra.gmra.mrb[0].mxu1 %v473_v47  ;;  %v1207_v47 = vld [vmem:[%s1630_s2 + $0xe0] sm:$0xff]  }
 0x1b8   : > { %1122 = vmatprep.mubr.msk.bf16.mxu1 %vm1288_vm0, %v1285_v3  ;;  %1093 = vmatpush3.bf16.msra.mxu0 %v1198_v52  ;;  %v615_v52 = vrot.slane %v1420_v22, %v1431_v30 }
 0x1b9   : > { %1094 = vmatprep.subr.bf16.mxu0 %v1285_v3  ;;  %1107 = vmatpush3.bf16.msra.mxu1 %v1203_v46 }
 0x1ba   : > { %1108 = vmatprep.subr.bf16.mxu1 %v1285_v3 }
 0x1bc   : > { %1095 = vmatpush3.bf16.msra.mxu0 %v1199_v53 }
 0x1bd   : > { %1096 = vmatprep.subr.bf16.mxu0 %v1285_v3 }
 0x1c0   : > { %1097 = vmatpush3.bf16.msra.mxu0 %v1200_v54 }
 0x1c1   : > { %1098 = vmatprep.subr.bf16.mxu0 %v1285_v3 }
 0x1c4   : > { %1099 = vmatpush3.bf16.msra.mxu0 %v1201_v55 }
 0x1c5   : > { %1100 = vmatprep.subr.bf16.mxu0 %v1285_v3 }
 0x1c8   : > { %1101 = vmatpush3.bf16.msra.mxu0 %v1202_v56 }
 0x28a   : > { %v560_v58 = vpop.f32.mrb[0].mxu1 }
 0x28b   : > { %v561_v59 = vadd.f32 %v560_v58, %v477_v57  ;;  %v1084_v60 = vpop.f32.mrb[1].mxu1 }
 0x28c   : > { %v563_v61 = vpop.f32.mrb[2].mxu1 }
 0x28d   : > { %v564_v62 = vadd.f32 %v563_v61, %v477_v57  ;;  %v1085_v63 = vpop.f32.mrb[3].mxu1  ;;  %v575_v0 = vmul.f32 %v561_v59, %v561_v59 }
 0x28f   : > { %v567_v1 = vadd.f32 %v564_v62, %v561_v59  ;;  %v576_v2 = vmul.f32 %v564_v62, %v564_v62 }
 0x291   : > { %v568_v4 = vrot.slane %v567_v1, 4  ;;  %v577_v5 = vadd.f32 %v576_v2, %v575_v0 }
 0x293   : > { %v569_v6 = vadd.f32 %v568_v4, %v567_v1  ;;  %v578_v7 = vrot.slane %v577_v5, 4 }
 0x295   : > { %v570_v8 = vrot.slane %v569_v6, 2  ;;  %v579_v9 = vadd.f32 %v578_v7, %v577_v5 }
 0x297   : > { %v571_v10 = vadd.f32 %v570_v8, %v569_v6  ;;  %v580_v11 = vrot.slane %v579_v9, 2 }
 0x299   : > { %v572_v12 = vrot.slane %v571_v10, 1  ;;  %v581_v13 = vadd.f32 %v580_v11, %v579_v9 }
 0x29b   : > { %v573_v14 = vadd.f32 %v572_v12, %v571_v10  ;;  %v582_v15 = vrot.slane %v581_v13, 1 }
 0x29d   : > { %v574_v18 = vmul.f32 0.0625, %v573_v14  ;;  %v583_v19 = vadd.f32 %v582_v15, %v581_v13 }
 0x29f   : > { %v584_v20 = vmul.f32 0.0625, %v583_v19  ;;  %v585_v21 = vmul.f32 %v574_v18, %v574_v18 }
 0x2a1   : > { %v586_v25 = vsub.f32 %v584_v20, %v585_v21 }
 0x2a3   : > { %v587_v26 = vadd.f32 0.001, %v586_v25 }
 0x2a5   : > { %1213 = vrsqrt.f32 %v587_v26 }
 0x2af   : > { %v1214_v28 = vpop.eup %1213 }
 0x2b0   : > { %v589_v29 = vmul.f32 %v1214_v28, %v1420_v22 }
 0x2b2   : > { %v590_v31 = vmul.f32 %v589_v29, %v574_v18  ;;  %v598_v32 = vrot.slane %v589_v29, %v597_v27  ;;  %v735_v18 = vsub.s32 7, %v1408_v16 }
 0x2b4   : > { %v592_v33 = vrot.slane %v590_v31, 4  ;;  %v599_v34 = vmul.f32 %v598_v32, %v561_v59  ;;  %v600_v35 = vmul.f32 %v598_v32, %v564_v62 }
 0x2b6   : > { %v594_v36 = vsub.f32 %v1483_v37, %v592_v33 }
 0x2b8   : > { %v604_v38 = vrot.slane %v594_v36, %v1426_v24  ;;  %v1204_v24 = vld [vmem:[%s1630_s2 + $0xc8] sm:$0xff]  }
 0x2b9   : > { %1109 = vmatpush3.bf16.msra.mxu1 %v1204_v24 }
 0x2ba   : > { %v605_v39 = vadd.f32 %v604_v38, %v599_v34  ;;  %v606_v40 = vadd.f32 %v604_v38, %v600_v35  ;;  %1110 = vmatprep.subr.bf16.mxu1 %v1285_v3  ;;  %v750_v38 = vsub.s32 4, %v1408_v16 }
 0x2bc   : > { %v608_v41 = vmax.f32 %v606_v40, 0.0  ;;  %v607_v42 = vmax.f32 %v605_v39, 0.0  ;;  %v751_v39 = vrot.slane %v1420_v22, %v750_v38 }
 0x2be   : > { %v1527_v43 = vadd.f32 %v607_v42, %v1436_v50  ;;  %v1530_v44 = vadd.f32 %v608_v41, %v1438_v51  ;;  %v1205_v50 = vld [vmem:[%s1630_s2 + $0xd0] sm:$0xff]   ;;  %v1206_v51 = vld [vmem:[%s1630_s2 + $0xd8] sm:$0xff]  }
 0x2bf   : > { %1111 = vmatpush3.bf16.msra.mxu1 %v1205_v50 }
 0x2c0   : > { %v611_v45 = vpack.c.bf16 %v1530_v44, %v1527_v43  ;;  %1112 = vmatprep.subr.bf16.mxu1 %v1285_v3 }
 0x2c2   : > { %1103 = vmatmul.mubr.bf16.vlgmr.msra.gmra.mrb[4].mxu0 %v611_v45 }
 0x2c3   : > { %1113 = vmatpush3.bf16.msra.mxu1 %v1206_v51 }
 0x2c4   : > { %1114 = vmatprep.subr.bf16.mxu1 %v1285_v3 }
 0x2c7   : > { %1115 = vmatpush3.bf16.msra.mxu1 %v1207_v47 }
 0x2c8   : > { %1116 = vmatprep.subr.bf16.mxu1 %v1285_v3 }
 0x2cb   : > { %1117 = vmatpush3.bf16.msra.mxu1 %v1208_v48 }
 0x2cc   : > { %1118 = vmatprep.subr.bf16.mxu1 %v1285_v3 }
 0x2cf   : > { %1119 = vmatpush3.bf16.msra.mxu1 %v1209_v23 }
 0x2d0   : > { %1120 = vmatprep.subr.bf16.mxu1 %v1285_v3 }
 0x2d3   : > { %1121 = vmatpush3.bf16.msra.mxu1 %v1210_v49 }
 0x395   : > { %v698_v53 = vpop.f32.mrb[4].mxu0 }
 0x396   : > { %v699_v54 = vadd.f32 %v698_v53, %v615_v52  ;;  %v1104_v55 = vpop.f32.mrb[5].mxu0 }
 0x397   : > { %v701_v56 = vpop.f32.mrb[6].mxu0 }
 0x398   : > { %v702_v57 = vadd.f32 %v701_v56, %v615_v52  ;;  %v1105_v58 = vpop.f32.mrb[7].mxu0  ;;  %v713_v59 = vmul.f32 %v699_v54, %v699_v54 }
 0x39a   : > { %v705_v60 = vadd.f32 %v702_v57, %v699_v54  ;;  %v714_v61 = vmul.f32 %v702_v57, %v702_v57 }
 0x39c   : > { %v706_v62 = vrot.slane %v705_v60, 4  ;;  %v715_v63 = vadd.f32 %v714_v61, %v713_v59 }
 0x39e   : > { %v707_v3 = vadd.f32 %v706_v62, %v705_v60  ;;  %v716_v0 = vrot.slane %v715_v63, 4 }
 0x3a0   : > { %v708_v1 = vrot.slane %v707_v3, 2  ;;  %v717_v2 = vadd.f32 %v716_v0, %v715_v63 }
 0x3a2   : > { %v709_v4 = vadd.f32 %v708_v1, %v707_v3  ;;  %v718_v5 = vrot.slane %v717_v2, 2 }
 0x3a4   : > { %v710_v6 = vrot.slane %v709_v4, 1  ;;  %v719_v7 = vadd.f32 %v718_v5, %v717_v2 }
 0x3a6   : > { %v711_v8 = vadd.f32 %v710_v6, %v709_v4  ;;  %v720_v9 = vrot.slane %v719_v7, 1 }
 0x3a8   : > { %v712_v10 = vmul.f32 0.0625, %v711_v8  ;;  %v721_v11 = vadd.f32 %v720_v9, %v719_v7 }
 0x3aa   : > { %v722_v12 = vmul.f32 0.0625, %v721_v11  ;;  %v723_v13 = vmul.f32 %v712_v10, %v712_v10 }
 0x3ac   : > { %v724_v14 = vsub.f32 %v722_v12, %v723_v13 }
 0x3ae   : > { %v725_v15 = vadd.f32 0.001, %v724_v14 }
 0x3b0   : > { %1215 = vrsqrt.f32 %v725_v15 }
 0x3ba   : > { %v1216_v19 = vpop.eup %1215 }
 0x3bb   : > { %v727_v20 = vmul.f32 %v1216_v19, %v1420_v22 }
 0x3bd   : > { %v728_v21 = vmul.f32 %v727_v20, %v712_v10  ;;  %v736_v25 = vrot.slane %v727_v20, %v735_v18 }
 0x3bf   : > { %v730_v26 = vrot.slane %v728_v21, 4  ;;  %v737_v27 = vmul.f32 %v736_v25, %v699_v54  ;;  %v738_v28 = vmul.f32 %v736_v25, %v702_v57 }
 0x3c1   : > { %v732_v29 = vsub.f32 %v1483_v37, %v730_v26 }
 0x3c3   : > { %v742_v31 = vrot.slane %v732_v29, %v1431_v30 }
 0x3c5   : > { %v744_v32 = vadd.f32 %v742_v31, %v738_v28  ;;  %v743_v33 = vadd.f32 %v742_v31, %v737_v27 }
 0x3c7   : > { %v746_v34 = vmax.f32 %v744_v32, 0.0  ;;  %v745_v35 = vmax.f32 %v743_v33, 0.0 }
 0x3c9   : > { %v747_v36 = vpack.c.bf16 %v746_v34, %v745_v35 }
 0x3cb   : > { %1123 = vmatmul.mubr.bf16.vlgmr.msra.gmra.mrb[4].mxu1 %v747_v36 }
 0x49e   : > { %v834_v40 = vpop.f32.mrb[4].mxu1 }
 0x49f   : > { %v835_v41 = vadd.f32 %v834_v40, %v751_v39  ;;  %v1124_v42 = vpop.f32.mrb[5].mxu1 }
 0x4a0   : > { %v837_v45 = vpop.f32.mrb[6].mxu1 }
 0x4a1   : > { %v838_v46 = vadd.f32 %v837_v45, %v751_v39  ;;  %v1125_v24 = vpop.f32.mrb[7].mxu1  ;;  %v849_v50 = vmul.f32 %v835_v41, %v835_v41 }
 0x4a3   : > { %v841_v51 = vadd.f32 %v838_v46, %v835_v41  ;;  %v850_v47 = vmul.f32 %v838_v46, %v838_v46 }
 0x4a5   : > { %v842_v30 = vrot.slane %v841_v51, 4  ;;  %v851_v48 = vadd.f32 %v850_v47, %v849_v50 }
 0x4a7   : > { %v843_v23 = vadd.f32 %v842_v30, %v841_v51  ;;  %v852_v49 = vrot.slane %v851_v48, 4 }
 0x4a9   : > { %v844_v52 = vrot.slane %v843_v23, 2  ;;  %v853_v53 = vadd.f32 %v852_v49, %v851_v48 }
 0x4ab   : > { %v845_v54 = vadd.f32 %v844_v52, %v843_v23  ;;  %v854_v16 = vrot.slane %v853_v53, 2 }
 0x4ad   : > { %v846_v55 = vrot.slane %v845_v54, 1  ;;  %v855_v22 = vadd.f32 %v854_v16, %v853_v53 }
 0x4af   : > { %v847_v56 = vadd.f32 %v846_v55, %v845_v54  ;;  %v856_v57 = vrot.slane %v855_v22, 1 }
 0x4b1   : > { %v848_v58 = vmul.f32 0.0625, %v847_v56  ;;  %v857_v59 = vadd.f32 %v856_v57, %v855_v22 }
 0x4b3   : > { %v858_v60 = vmul.f32 0.0625, %v857_v59  ;;  %v859_v61 = vmul.f32 %v848_v58, %v848_v58 }
 0x4b5   : > { %v860_v62 = vsub.f32 %v858_v60, %v859_v61 }
 0x4b7   : > { %v861_v63 = vadd.f32 0.001, %v860_v62 }
 0x4b9   : > { %1217 = vrsqrt.f32 %v861_v63 }
 0x4c3   : > { %v1218_v3 = vpop.eup %1217 }
 0x4c4   : > { %v863_v0 = vmul.f32 %v1218_v3, %v1483_v37 }
 0x4c6   : > { %v864_v1 = vmul.f32 %v863_v0, %v848_v58  ;;  %v872_v2 = vrot.slane %v863_v0, %v1411_v17 }
 0x4c8   : > { %v866_v4 = vrot.slane %v864_v1, 4  ;;  %v873_v5 = vmul.f32 %v872_v2, %v835_v41  ;;  %v874_v6 = vmul.f32 %v872_v2, %v838_v46 }
 0x4ca   : > { %v868_v7 = vsub.f32 %v1483_v37, %v866_v4 }
 0x4cc   : > { %v878_v8 = vrot.slane %v868_v7, %v750_v38 }
 0x4ce   : > { %v879_v9 = vadd.f32 %v878_v8, %v873_v5  ;;  %v880_v10 = vadd.f32 %v878_v8, %v874_v6 }
 0x4d0   : > { %v881_v11 = vmax.f32 %v879_v9, 0.0  ;;  %v882_v12 = vmax.f32 %v880_v10, 0.0 }
 0x4d2   : > { %v883_v17 = vadd.f32 %v881_v11, %v1527_v43  ;;  %v884_v37 = vadd.f32 %v882_v12, %v1530_v44 }
 0x4d4   : > { %886 = vst.msk [vmem:[%s190_s11] sm:$0xff] %vm885_vm1, %v883_v17  ;;  %887 = vst.msk [vmem:[%s190_s11 + $0x8] sm:$0xff] %vm885_vm1, %v884_v37 }
 0x4d5   : > { %1232 = shalt.err (!%p1229_p3)
}
 0x4d6   : > { %s1233_s29 = scalar_lea.hbm %s1581_s20, 256  ;;  %s1237_s6 = scalar_lea.hbm %s1632_s4, 512 }
 0x4d7   : > { %p1234_p4 = scmp.ne.s32.totalorder %s1581_s20, %s1233_s29  ;;  %p1238_p9 = scmp.lt.u32.totalorder %s1581_s20, %s1632_s4 }
 0x4d8   : > { %p1239_p10 = scmp.lt.u32.totalorder %s1237_s6, %s1233_s29  ;;  %p1241_p12 = scmp.lt.u32.totalorder %s1233_s29, %s1581_s20 }
 0x4d9   : > { %p1235_p7 = pnand %p1234_p4, %p1355_p5 }
 0x4da   : > { %p1240_p11 = por %p1239_p10, %p1238_p9 }
 0x4db   : > { %p1236_p8 = pneg %p1235_p7 }
 0x4dc   : > { %p1242_p13 = por %p1241_p12, %p1240_p11 }
 0x4de   : > { %p1243_p0 = pnand %p1242_p13, %p1236_p8 }
 0x4e0   : > { %1246 = shalt.err (!%p1243_p0)
}
 0x4e1   : > { %s1290_s9 = smov 128   ;;  %s1291_s10 = smov 8  }
 0x4e2   : > { %1126 = dma.vmem_to_hbm [thread:$0]  (%p1355_p5), %s1583_s12, 256, %s1581_s20, %s1587_s19, %s1290_s9, %s1290_s9, %s1291_s10  }
 0x4e3 PF: > { %p1132_p1 = scmp.ge.s32.totalorder %s1281_s18, 2  ;;  %s917_s11 = sand.u32 1, %s1269_s15  }
 0x4e4   : > { %s918_s13 = scalar_lea.sflag [#allocation3], %s917_s11 }
 0x4e5   : > { %p1129_p2 = pnand %p1132_p1, %p1359_p6 }
 0x4e7   : > { %1264 = dma.done.wait (!%p1129_p2), %s918_s13, 256  }
 0x4e8   : > { %1266 = vsyncadd (!%p1129_p2), %s918_s13, 4294967040  ;;  %p14_p3 = scmp.ge.s32.totalorder %s1342_s21, 4   ;;  %s1635_s15 = smov %s1273_s16 }
 0x4e9   : > { %s1636_s16 = smov %s1277_s17  ;;  %s1637_s17 = smov %s1353_s24 }
 0x4ea   : > { %s1638_s18 = smov %s1342_s21  ;;  %16 = sbr.rel (!%p14_p3) target bundleno = 3 (0x3), region = 71 }
 0x4f1   :  { %923 = vsyncpa [#allocation3], 1 }
 0x4f2   :  { %925 = vsyncpa [#allocation3 + $0x1], 1 }

</bundles_post_ra>
